<compile_context>
chip_gen: v6e
topology: v6e:2x2x1
jax: 0.10.0
libtpu: 0.0.40
codegen_flags: <defaults>
</compile_context>

<pallas_src>
import math

import jax
import jax.numpy as jnp
import numpy as np
from jax.experimental import pallas as pl
from jax.experimental.pallas import tpu as pltpu

_GELU_C = math.sqrt(2.0 / math.pi)
_MXU_DTYPE = jnp.bfloat16          # MXU-native input dtype (f32 accumulation)


# ----------------------------- shared helpers (traced) ----------------------

def _gelu(x):
    # original GPT-2 tanh-approximation gelu
    return 0.5 * x * (1.0 + jnp.tanh(_GELU_C * (x + 0.044715 * x * x * x)))


def _layer_norm(x, g, b, eps):
    u = jnp.mean(x, axis=-1, keepdims=True)
    d = x - u
    s = jnp.mean(d * d, axis=-1, keepdims=True)
    return d * jax.lax.rsqrt(s + eps) * g + b        # rsqrt -> EUP slot


# ----------------------------- wrapper-side helpers --------------------------

def _block_spec(shape, index_map, *, single_buffer=False):
    """BlockSpec; grid-invariant blocks request single buffering (halves VMEM)."""
    if single_buffer and hasattr(pl, "Buffered"):
        try:
            return pl.BlockSpec(shape, index_map, pipeline_mode=pl.Buffered(1))
        except Exception:
            pass
    return pl.BlockSpec(shape, index_map)


def _vmem_limit_bytes():
    """Generation-aware scoped-VMEM limit (don't ship a constant sized for 128MiB)."""
    cap = 128 * 1024 * 1024
    try:
        cap = int(pltpu.get_tpu_info().vmem_capacity_bytes)
    except Exception:
        pass
    # ~96 MiB on 128-MiB parts (v5e/v6e), ~40 MiB on 64-MiB parts (v7x)
    return max(32 * 1024 * 1024, min(96 * 1024 * 1024, cap - 24 * 1024 * 1024))


# ----------------------------- kernel 1: ln_1 + merged QKV -------------------

def _make_qkv_kernel(n_head, eps):
    def kernel(x_ref, g_ref, b_ref, w_ref, bqkv_ref, q_ref, k_ref, v_ref):
        D = q_ref.shape[-1]
        C = n_head * D
        x = x_ref[0].astype(jnp.float32)                        # (tq, C)
        h = _layer_norm(x, g_ref[...], b_ref[...], eps)
        # one merged (tq,C)x(C,3C) projection on the MXU (bf16 in, f32 accum)
        qkv = jnp.dot(h.astype(_MXU_DTYPE), w_ref[...],
                      preferred_element_type=jnp.float32) + bqkv_ref[...]
        # head-split stores (static lane slices) directly into the (1,H,tq,D)
        # output blocks -> no wrapper-side q/k/v transposes / extra HBM passes.
        for hh in range(n_head):
            q_ref[0, hh] = qkv[:, hh * D:(hh + 1) * D].astype(q_ref.dtype)
            k_ref[0, hh] = qkv[:, C + hh * D:C + (hh + 1) * D].astype(k_ref.dtype)
            v_ref[0, hh] = qkv[:, 2 * C + hh * D:2 * C + (hh + 1) * D].astype(v_ref.dtype)
    return kernel


# ----------------------------- kernel 2: flash attn + c_proj + residual ------

def _make_attn_kernel(scale, tq, n_head):
    def kernel(x_ref, q_ref, k_ref, v_ref, wp_ref, bp_ref, o_ref,
               m_scr, l_scr, acc_scr, omrg_scr):
        i = pl.program_id(1)                  # query-tile index
        kv = pl.program_id(2)                 # kv-tile index (tkv == tq)
        D = q_ref.shape[-1]

        @pl.when(kv == 0)
        def _():
            m_scr[...] = jnp.full_like(m_scr, -jnp.inf)
            l_scr[...] = jnp.zeros_like(l_scr)
            acc_scr[...] = jnp.zeros_like(acc_scr)

        # flash step; KV tiles strictly above the causal diagonal are skipped
        # (and their k/v blocks are never re-fetched thanks to the clamped
        # index_map in the wrapper).
        @pl.when(kv <= i)
        def _():
            qb = q_ref[0].astype(_MXU_DTYPE)                    # (H, tq, D)
            kb = k_ref[0].astype(_MXU_DTYPE)                    # (H, tkv, D)
            vb = v_ref[0].astype(_MXU_DTYPE)                    # (H, tkv, D)
            s = jnp.einsum('hqd,hkd->hqk', qb, kb,
                           preferred_element_type=jnp.float32)  # (H, tq, tkv)
            if scale:
                s = s * (1.0 / math.sqrt(D))
            row = jax.lax.broadcasted_iota(jnp.int32, (1, tq, tq), 1) + i * tq
            col = jax.lax.broadcasted_iota(jnp.int32, (1, tq, tq), 2) + kv * tq
            s = jnp.where(col <= row, s, -1e9)

            m_prev = m_scr[...]
            m_new = jnp.maximum(m_prev, jnp.max(s, axis=-1, keepdims=True))
            alpha = jnp.exp(m_prev - m_new)
            p = jnp.exp(s - m_new)
            l_scr[...] = alpha * l_scr[...] + jnp.sum(p, axis=-1, keepdims=True)
            acc_scr[...] = alpha * acc_scr[...] + jnp.einsum(
                'hqk,hkd->hqd', p.astype(_MXU_DTYPE), vb,
                preferred_element_type=jnp.float32)
            m_scr[...] = m_new

        @pl.when(kv == pl.num_programs(2) - 1)
        def _():
            inv_l = pl.reciprocal(l_scr[...], approx=True)      # EUP slot
            o = acc_scr[...] * inv_l                            # (H, tq, D)
            # merge heads into a lane-dense (tq, C) slab so c_proj is a single
            # K=C matmul (full MXU occupancy) instead of H K=D matmuls.
            for hh in range(n_head):
                omrg_scr[:, hh * D:(hh + 1) * D] = o[hh]
            a = jnp.dot(omrg_scr[...].astype(_MXU_DTYPE), wp_ref[...],
                        preferred_element_type=jnp.float32) + bp_ref[...]
            o_ref[0] = (x_ref[0].astype(jnp.float32) + a).astype(o_ref.dtype)
    return kernel


# ----------------------------- kernel 3: ln_2 + MLP + residual ----------------

def _make_mlp_kernel(eps):
    def kernel(x1_ref, g_ref, b_ref, wfc_ref, bfc_ref, wmp_ref, bmp_ref,
               y_ref, h2_scr, acc_scr):
        n = pl.program_id(2)

        @pl.when(n == 0)
        def _():
            x1 = x1_ref[0].astype(jnp.float32)
            h2_scr[...] = _layer_norm(x1, g_ref[...], b_ref[...], eps).astype(h2_scr.dtype)
            acc_scr[...] = jnp.zeros_like(acc_scr)

        # one chunk of the 4*C hidden dimension per grid step (nf == 1 when the
        # bf16 weights are fully VMEM-resident, which is the common case)
        hfc = jnp.dot(h2_scr[...], wfc_ref[...],
                      preferred_element_type=jnp.float32) + bfc_ref[...]
        hfc = _gelu(hfc)
        acc_scr[...] += jnp.dot(hfc.astype(_MXU_DTYPE), wmp_ref[...],
                                preferred_element_type=jnp.float32)

        @pl.when(n == pl.num_programs(2) - 1)
        def _():
            y_ref[0] = (x1_ref[0].astype(jnp.float32)
                        + acc_scr[...] + bmp_ref[...]).astype(y_ref.dtype)
    return kernel


# ----------------------------- wrapper ----------------------------------------

def gpt2_block(x, params, *, n_head, scale=False, eps=1e-5,
               q_tile=128, ff_tile=512):
    """GPT-2 Block forward. Returns (y, present) with
    y: (B, T, C), present: (2, B, n_head, T, C // n_head)."""
    (ln1_g, ln1_b, w_attn, b_attn, w_aproj, b_aproj,
     ln2_g, ln2_b, w_fc, b_fc, w_mproj, b_mproj) = params

    B, T, C = x.shape
    H = n_head
    D = C // H
    F = 4 * C
    assert C == H * D

    tq = min(q_tile, T)
    assert T % tq == 0, "sequence length must divide the query tile"
    nq = T // tq
    nkv = nq                     # tkv == tq

    vmem_limit = _vmem_limit_bytes()

    # keep the full MLP weights VMEM-resident (loaded once for the whole grid)
    # whenever the bf16 copies comfortably fit; otherwise chunk the hidden dim
    # (chunked weights get re-streamed per query tile -- acceptable fallback).
    mlp_weight_bytes = 2 * C * F * jnp.dtype(_MXU_DTYPE).itemsize
    tn = F if mlp_weight_bytes <= vmem_limit // 3 else min(ff_tile, F)
    assert F % tn == 0, "4*n_embd must divide the ff tile"
    nf = F // tn
    mlp_resident = (nf == 1)

    # bf16 weight copies: half the HBM/VMEM traffic, MXU-native inputs.
    w_attn_c = w_attn.astype(_MXU_DTYPE)
    w_aproj_c = w_aproj.astype(_MXU_DTYPE)
    w_fc_c = w_fc.astype(_MXU_DTYPE)
    w_mproj_c = w_mproj.astype(_MXU_DTYPE)

    # (B, nq) axes are 'parallel' -> sharded across TensorCores on v7x megacore.
    cparams2 = pltpu.CompilerParams(
        dimension_semantics=("parallel", "parallel"),
        vmem_limit_bytes=vmem_limit)
    cparams3 = pltpu.CompilerParams(
        dimension_semantics=("parallel", "parallel", "arbitrary"),
        vmem_limit_bytes=vmem_limit)

    # ---- kernel 1: ln_1 + merged QKV projection, head-split outputs ----
    qh, kh, vh = pl.pallas_call(
        _make_qkv_kernel(H, eps),
        grid=(B, nq),
        in_specs=[
            pl.BlockSpec((1, tq, C), lambda b, i: (b, i, 0)),                    # x
            _block_spec((1, C), lambda b, i: (0, 0), single_buffer=True),        # ln_1.w
            _block_spec((1, C), lambda b, i: (0, 0), single_buffer=True),        # ln_1.b
            _block_spec((C, 3 * C), lambda b, i: (0, 0), single_buffer=True),    # c_attn.w
            _block_spec((1, 3 * C), lambda b, i: (0, 0), single_buffer=True),    # c_attn.b
        ],
        out_specs=[pl.BlockSpec((1, H, tq, D), lambda b, i: (b, 0, i, 0))
                   for _ in range(3)],
        out_shape=[jax.ShapeDtypeStruct((B, H, T, D), x.dtype)
                   for _ in range(3)],
        compiler_params=cparams2,
    )(x, ln1_g, ln1_b, w_attn_c, b_attn)

    present = jnp.stack([kh, vh], axis=0)                       # (2, B, H, T, D)

    # ---- kernel 2: flash attention (causal skip) + c_proj + residual ----
    def kv_map(b, i, kv):
        # clamp so fully-masked KV tiles (kv > i) are never re-DMA'd
        return (b, 0, jnp.minimum(kv, i), 0)

    x1 = pl.pallas_call(
        _make_attn_kernel(scale, tq, H),
        grid=(B, nq, nkv),
        in_specs=[
            pl.BlockSpec((1, tq, C), lambda b, i, kv: (b, i, 0)),                # x (residual)
            pl.BlockSpec((1, H, tq, D), lambda b, i, kv: (b, 0, i, 0)),          # q heads
            pl.BlockSpec((1, H, tq, D), kv_map),                                 # k tile
            pl.BlockSpec((1, H, tq, D), kv_map),                                 # v tile
            _block_spec((C, C), lambda b, i, kv: (0, 0), single_buffer=True),    # attn c_proj.w
            _block_spec((1, C), lambda b, i, kv: (0, 0), single_buffer=True),    # attn c_proj.b
        ],
        out_specs=pl.BlockSpec((1, tq, C), lambda b, i, kv: (b, i, 0)),
        out_shape=jax.ShapeDtypeStruct((B, T, C), x.dtype),
        scratch_shapes=[pltpu.VMEM((H, tq, 1), jnp.float32),    # running max
                        pltpu.VMEM((H, tq, 1), jnp.float32),    # running denom
                        pltpu.VMEM((H, tq, D), jnp.float32),    # running PV accum
                        pltpu.VMEM((tq, C), jnp.float32)],      # head-merge slab
        compiler_params=cparams3,
    )(x, qh, kh, vh, w_aproj_c, b_aproj)

    # ---- kernel 3: ln_2 + MLP + residual ----
    y = pl.pallas_call(
        _make_mlp_kernel(eps),
        grid=(B, nq, nf),
        in_specs=[
            pl.BlockSpec((1, tq, C), lambda b, i, n: (b, i, 0)),                 # x1
            _block_spec((1, C), lambda b, i, n: (0, 0), single_buffer=True),     # ln_2.w
            _block_spec((1, C), lambda b, i, n: (0, 0), single_buffer=True),     # ln_2.b
            _block_spec((C, tn), lambda b, i, n: (0, n), single_buffer=mlp_resident),  # c_fc.w
            _block_spec((1, tn), lambda b, i, n: (0, n), single_buffer=mlp_resident),  # c_fc.b
            _block_spec((tn, C), lambda b, i, n: (n, 0), single_buffer=mlp_resident),  # mlp c_proj.w
            _block_spec((1, C), lambda b, i, n: (0, 0), single_buffer=True),     # mlp c_proj.b
        ],
        out_specs=pl.BlockSpec((1, tq, C), lambda b, i, n: (b, i, 0)),
        out_shape=jax.ShapeDtypeStruct((B, T, C), x.dtype),
        scratch_shapes=[pltpu.VMEM((tq, C), _MXU_DTYPE),        # ln_2(x1) (bf16)
                        pltpu.VMEM((tq, C), jnp.float32)],      # MLP accumulator
        compiler_params=cparams3,
    )(x1, ln2_g, ln2_b, w_fc_c, b_fc, w_mproj_c, b_mproj)

    return y, present


# ----------------------------- pure-JAX reference (f32) -----------------------

def gpt2_block_ref(x, params, *, n_head, scale=False, eps=1e-5):
    (ln1_g, ln1_b, w_attn, b_attn, w_aproj, b_aproj,
     ln2_g, ln2_b, w_fc, b_fc, w_mproj, b_mproj) = params
    B, T, C = x.shape
    D = C // n_head

    h = _layer_norm(x, ln1_g, ln1_b, eps)
    qkv = h @ w_attn + b_attn
    q, k, v = jnp.split(qkv, 3, axis=-1)

    def split_heads(t):
        return t.reshape(B, T, n_head, D).transpose(0, 2, 1, 3)  # (B,H,T,D)

    qh, kh, vh = split_heads(q), split_heads(k), split_heads(v)
    w = jnp.einsum('bhtd,bhsd->bhts', qh, kh)
    if scale:
        w = w / math.sqrt(D)
    bmask = jnp.tril(jnp.ones((T, T), jnp.float32))
    w = w * bmask + (-1e9) * (1.0 - bmask)
    p = jax.nn.softmax(w, axis=-1)
    a = jnp.einsum('bhts,bhsd->bhtd', p, vh)
    a = a.transpose(0, 2, 1, 3).reshape(B, T, C)
    a = a @ w_aproj + b_aproj
    x1 = x + a

    h2 = _layer_norm(x1, ln2_g, ln2_b, eps)
    m = _gelu(h2 @ w_fc + b_fc) @ w_mproj + b_mproj
    y = x1 + m
    present = jnp.stack([kh, vh], axis=0)
    return y, present


# ----------------------------- main --------------------------------------------

if __name__ == "__main__":
    B, T, C, H = 2, 8, 32, 4          # batch, seq (n_ctx), n_embd, n_head
    eps = 1e-5
    scale = False                      # matches Block(..., scale=False) default

    key = jax.random.PRNGKey(0)
    ks = jax.random.split(key, 6)

    x = jax.random.normal(ks[0], (B, T, C), jnp.float32)

    std = 0.02
    params = (
        jnp.ones((1, C), jnp.float32),                                  # ln_1.weight
        jnp.zeros((1, C), jnp.float32),                                 # ln_1.bias
        std * jax.random.normal(ks[1], (C, 3 * C), jnp.float32),        # c_attn.w
        jnp.zeros((1, 3 * C), jnp.float32),                             # c_attn.b
        std * jax.random.normal(ks[2], (C, C), jnp.float32),            # attn c_proj.w
        jnp.zeros((1, C), jnp.float32),                                 # attn c_proj.b
        jnp.ones((1, C), jnp.float32),                                  # ln_2.weight
        jnp.zeros((1, C), jnp.float32),                                 # ln_2.bias
        std * jax.random.normal(ks[3], (C, 4 * C), jnp.float32),        # c_fc.w
        jnp.zeros((1, 4 * C), jnp.float32),                             # c_fc.b
        std * jax.random.normal(ks[4], (4 * C, C), jnp.float32),        # mlp c_proj.w
        jnp.zeros((1, C), jnp.float32),                                 # mlp c_proj.b
    )

    y, present = gpt2_block(x, params, n_head=H, scale=scale, eps=eps)
    jax.block_until_ready((y, present))

    y_ref, present_ref = gpt2_block_ref(x, params, n_head=H, scale=scale, eps=eps)
    # bf16 MXU inputs (f32 accumulation) vs. the f32 reference -> loosened tolerances.
    np.testing.assert_allclose(np.asarray(y), np.asarray(y_ref), rtol=2e-2, atol=2e-2)
    np.testing.assert_allclose(np.asarray(present), np.asarray(present_ref),
                               rtol=2e-2, atol=2e-2)

    print("KERNEL_OK")
</pallas_src>

<mosaic_0001>
module attributes {stable_mosaic.version = 11 : i64} {
  func.func @kernel(%arg0: i32, %arg1: i32, %arg2: memref<1x8x32xf32, #tpu.memory_space<vmem>>, %arg3: memref<1x32xf32, #tpu.memory_space<vmem>>, %arg4: memref<1x32xf32, #tpu.memory_space<vmem>>, %arg5: memref<32x96xbf16, #tpu.memory_space<vmem>>, %arg6: memref<1x96xf32, #tpu.memory_space<vmem>>, %arg7: memref<1x4x8x8xf32, #tpu.memory_space<vmem>>, %arg8: memref<1x4x8x8xf32, #tpu.memory_space<vmem>>, %arg9: memref<1x4x8x8xf32, #tpu.memory_space<vmem>>) attributes {dimension_semantics = [#tpu.dimension_semantics<parallel>, #tpu.dimension_semantics<parallel>], iteration_bounds = array<i64: 2, 1>, scalar_prefetch = 0 : i64, scratch_operands = 0 : i64, tpu.core_type = #tpu.core_type<tc>, window_params = [{transform_indices = @transform_0, window_bounds = array<i64: 1, 8, 32>}, {pipeline_mode = #tpu.pipeline_mode<synchronous>, transform_indices = @transform_1, window_bounds = array<i64: 1, 32>}, {pipeline_mode = #tpu.pipeline_mode<synchronous>, transform_indices = @transform_2, window_bounds = array<i64: 1, 32>}, {pipeline_mode = #tpu.pipeline_mode<synchronous>, transform_indices = @transform_3, window_bounds = array<i64: 32, 96>}, {pipeline_mode = #tpu.pipeline_mode<synchronous>, transform_indices = @transform_4, window_bounds = array<i64: 1, 96>}, {transform_indices = @transform_5, window_bounds = array<i64: 1, 4, 8, 8>}, {transform_indices = @transform_6, window_bounds = array<i64: 1, 4, 8, 8>}, {transform_indices = @transform_7, window_bounds = array<i64: 1, 4, 8, 8>}]} {
    %c0 = arith.constant 0 : index
    %c0_0 = arith.constant 0 : index
    %c0_1 = arith.constant 0 : index
    %0 = vector.load %arg2[%c0, %c0_0, %c0_1] : memref<1x8x32xf32, #tpu.memory_space<vmem>>, vector<1x8x32xf32>
    %1 = vector.shape_cast %0 : vector<1x8x32xf32> to vector<8x32xf32>
    %c0_2 = arith.constant 0 : index
    %c0_3 = arith.constant 0 : index
    %2 = vector.load %arg3[%c0_2, %c0_3] : memref<1x32xf32, #tpu.memory_space<vmem>>, vector<1x32xf32>
    %c0_4 = arith.constant 0 : index
    %c0_5 = arith.constant 0 : index
    %3 = vector.load %arg4[%c0_4, %c0_5] : memref<1x32xf32, #tpu.memory_space<vmem>>, vector<1x32xf32>
    %cst = arith.constant dense<0.000000e+00> : vector<8xf32>
    %4 = vector.multi_reduction <add>, %1, %cst [1] : vector<8x32xf32> to vector<8xf32>
    %5 = vector.shape_cast %4 : vector<8xf32> to vector<8x1xf32>
    %cst_6 = arith.constant 3.200000e+01 : f32
    %6 = vector.broadcast %cst_6 : f32 to vector<8x1xf32>
    %7 = arith.divf %5, %6 : vector<8x1xf32>
    %8 = vector.broadcast %7 : vector<8x1xf32> to vector<8x32xf32>
    %9 = arith.subf %1, %8 : vector<8x32xf32>
    %10 = arith.mulf %9, %9 : vector<8x32xf32>
    %cst_7 = arith.constant dense<0.000000e+00> : vector<8xf32>
    %11 = vector.multi_reduction <add>, %10, %cst_7 [1] : vector<8x32xf32> to vector<8xf32>
    %12 = vector.shape_cast %11 : vector<8xf32> to vector<8x1xf32>
    %cst_8 = arith.constant 3.200000e+01 : f32
    %13 = vector.broadcast %cst_8 : f32 to vector<8x1xf32>
    %14 = arith.divf %12, %13 : vector<8x1xf32>
    %cst_9 = arith.constant 9.99999974E-6 : f32
    %15 = vector.broadcast %cst_9 : f32 to vector<8x1xf32>
    %16 = arith.addf %14, %15 : vector<8x1xf32>
    %17 = math.rsqrt %16 : vector<8x1xf32>
    %18 = vector.broadcast %17 : vector<8x1xf32> to vector<8x32xf32>
    %19 = arith.mulf %9, %18 : vector<8x32xf32>
    %20 = vector.broadcast %2 : vector<1x32xf32> to vector<8x32xf32>
    %21 = arith.mulf %19, %20 : vector<8x32xf32>
    %22 = vector.broadcast %3 : vector<1x32xf32> to vector<8x32xf32>
    %23 = arith.addf %21, %22 : vector<8x32xf32>
    %24 = arith.truncf %23 : vector<8x32xf32> to vector<8x32xbf16>
    %c0_10 = arith.constant 0 : index
    %c0_11 = arith.constant 0 : index
    %25 = vector.load %arg5[%c0_10, %c0_11] : memref<32x96xbf16, #tpu.memory_space<vmem>>, vector<32x96xbf16>
    %cst_12 = arith.constant dense<0.000000e+00> : vector<8x96xf32>
    %26 = tpu.matmul %24, %25, %cst_12 {dimension_numbers = #tpu.dot_dimension_numbers<[1], [0], [0], [1], [0, 0, 1, 1], [], []>} : vector<8x32xbf16>, vector<32x96xbf16>, vector<8x96xf32> -> vector<8x96xf32>
    %c0_13 = arith.constant 0 : index
    %c0_14 = arith.constant 0 : index
    %27 = vector.load %arg6[%c0_13, %c0_14] : memref<1x96xf32, #tpu.memory_space<vmem>>, vector<1x96xf32>
    %28 = vector.broadcast %27 : vector<1x96xf32> to vector<8x96xf32>
    %29 = arith.addf %26, %28 : vector<8x96xf32>
    %30 = vector.extract_strided_slice %29 {offsets = [0, 0], sizes = [8, 8], strides = [1, 1]} : vector<8x96xf32> to vector<8x8xf32>
    %c0_15 = arith.constant 0 : index
    %c0_16 = arith.constant 0 : index
    %c0_17 = arith.constant 0 : index
    %c0_18 = arith.constant 0 : index
    %31 = vector.load %arg7[%c0_15, %c0_16, %c0_17, %c0_18] : memref<1x4x8x8xf32, #tpu.memory_space<vmem>>, vector<1x1x8x8xf32>
    %32 = vector.shape_cast %31 : vector<1x1x8x8xf32> to vector<8x8xf32>
    %33 = vector.shape_cast %30 : vector<8x8xf32> to vector<1x1x8x8xf32>
    tpu.vector_store %arg7[%c0_15, %c0_16, %c0_17, %c0_18], %33 {strides = array<i32>} : memref<1x4x8x8xf32, #tpu.memory_space<vmem>>, vector<1x1x8x8xf32>,
    %34 = vector.extract_strided_slice %29 {offsets = [0, 32], sizes = [8, 8], strides = [1, 1]} : vector<8x96xf32> to vector<8x8xf32>
    %c0_19 = arith.constant 0 : index
    %c0_20 = arith.constant 0 : index
    %c0_21 = arith.constant 0 : index
    %c0_22 = arith.constant 0 : index
    %35 = vector.load %arg8[%c0_19, %c0_20, %c0_21, %c0_22] : memref<1x4x8x8xf32, #tpu.memory_space<vmem>>, vector<1x1x8x8xf32>
    %36 = vector.shape_cast %35 : vector<1x1x8x8xf32> to vector<8x8xf32>
    %37 = vector.shape_cast %34 : vector<8x8xf32> to vector<1x1x8x8xf32>
    tpu.vector_store %arg8[%c0_19, %c0_20, %c0_21, %c0_22], %37 {strides = array<i32>} : memref<1x4x8x8xf32, #tpu.memory_space<vmem>>, vector<1x1x8x8xf32>,
    %38 = vector.extract_strided_slice %29 {offsets = [0, 64], sizes = [8, 8], strides = [1, 1]} : vector<8x96xf32> to vector<8x8xf32>
    %c0_23 = arith.constant 0 : index
    %c0_24 = arith.constant 0 : index
    %c0_25 = arith.constant 0 : index
    %c0_26 = arith.constant 0 : index
    %39 = vector.load %arg9[%c0_23, %c0_24, %c0_25, %c0_26] : memref<1x4x8x8xf32, #tpu.memory_space<vmem>>, vector<1x1x8x8xf32>
    %40 = vector.shape_cast %39 : vector<1x1x8x8xf32> to vector<8x8xf32>
    %41 = vector.shape_cast %38 : vector<8x8xf32> to vector<1x1x8x8xf32>
    tpu.vector_store %arg9[%c0_23, %c0_24, %c0_25, %c0_26], %41 {strides = array<i32>} : memref<1x4x8x8xf32, #tpu.memory_space<vmem>>, vector<1x1x8x8xf32>,
    %42 = vector.extract_strided_slice %29 {offsets = [0, 8], sizes = [8, 8], strides = [1, 1]} : vector<8x96xf32> to vector<8x8xf32>
    %c0_27 = arith.constant 0 : index
    %c1 = arith.constant 1 : index
    %c0_28 = arith.constant 0 : index
    %c0_29 = arith.constant 0 : index
    %43 = vector.load %arg7[%c0_27, %c1, %c0_28, %c0_29] : memref<1x4x8x8xf32, #tpu.memory_space<vmem>>, vector<1x1x8x8xf32>
    %44 = vector.shape_cast %43 : vector<1x1x8x8xf32> to vector<8x8xf32>
    %45 = vector.shape_cast %42 : vector<8x8xf32> to vector<1x1x8x8xf32>
    tpu.vector_store %arg7[%c0_27, %c1, %c0_28, %c0_29], %45 {strides = array<i32>} : memref<1x4x8x8xf32, #tpu.memory_space<vmem>>, vector<1x1x8x8xf32>,
    %46 = vector.extract_strided_slice %29 {offsets = [0, 40], sizes = [8, 8], strides = [1, 1]} : vector<8x96xf32> to vector<8x8xf32>
    %c0_30 = arith.constant 0 : index
    %c1_31 = arith.constant 1 : index
    %c0_32 = arith.constant 0 : index
    %c0_33 = arith.constant 0 : index
    %47 = vector.load %arg8[%c0_30, %c1_31, %c0_32, %c0_33] : memref<1x4x8x8xf32, #tpu.memory_space<vmem>>, vector<1x1x8x8xf32>
    %48 = vector.shape_cast %47 : vector<1x1x8x8xf32> to vector<8x8xf32>
    %49 = vector.shape_cast %46 : vector<8x8xf32> to vector<1x1x8x8xf32>
    tpu.vector_store %arg8[%c0_30, %c1_31, %c0_32, %c0_33], %49 {strides = array<i32>} : memref<1x4x8x8xf32, #tpu.memory_space<vmem>>, vector<1x1x8x8xf32>,
    %50 = vector.extract_strided_slice %29 {offsets = [0, 72], sizes = [8, 8], strides = [1, 1]} : vector<8x96xf32> to vector<8x8xf32>
    %c0_34 = arith.constant 0 : index
    %c1_35 = arith.constant 1 : index
    %c0_36 = arith.constant 0 : index
    %c0_37 = arith.constant 0 : index
    %51 = vector.load %arg9[%c0_34, %c1_35, %c0_36, %c0_37] : memref<1x4x8x8xf32, #tpu.memory_space<vmem>>, vector<1x1x8x8xf32>
    %52 = vector.shape_cast %51 : vector<1x1x8x8xf32> to vector<8x8xf32>
    %53 = vector.shape_cast %50 : vector<8x8xf32> to vector<1x1x8x8xf32>
    tpu.vector_store %arg9[%c0_34, %c1_35, %c0_36, %c0_37], %53 {strides = array<i32>} : memref<1x4x8x8xf32, #tpu.memory_space<vmem>>, vector<1x1x8x8xf32>,
    %54 = vector.extract_strided_slice %29 {offsets = [0, 16], sizes = [8, 8], strides = [1, 1]} : vector<8x96xf32> to vector<8x8xf32>
    %c0_38 = arith.constant 0 : index
    %c2 = arith.constant 2 : index
    %c0_39 = arith.constant 0 : index
    %c0_40 = arith.constant 0 : index
    %55 = vector.load %arg7[%c0_38, %c2, %c0_39, %c0_40] : memref<1x4x8x8xf32, #tpu.memory_space<vmem>>, vector<1x1x8x8xf32>
    %56 = vector.shape_cast %55 : vector<1x1x8x8xf32> to vector<8x8xf32>
    %57 = vector.shape_cast %54 : vector<8x8xf32> to vector<1x1x8x8xf32>
    tpu.vector_store %arg7[%c0_38, %c2, %c0_39, %c0_40], %57 {strides = array<i32>} : memref<1x4x8x8xf32, #tpu.memory_space<vmem>>, vector<1x1x8x8xf32>,
    %58 = vector.extract_strided_slice %29 {offsets = [0, 48], sizes = [8, 8], strides = [1, 1]} : vector<8x96xf32> to vector<8x8xf32>
    %c0_41 = arith.constant 0 : index
    %c2_42 = arith.constant 2 : index
    %c0_43 = arith.constant 0 : index
    %c0_44 = arith.constant 0 : index
    %59 = vector.load %arg8[%c0_41, %c2_42, %c0_43, %c0_44] : memref<1x4x8x8xf32, #tpu.memory_space<vmem>>, vector<1x1x8x8xf32>
    %60 = vector.shape_cast %59 : vector<1x1x8x8xf32> to vector<8x8xf32>
    %61 = vector.shape_cast %58 : vector<8x8xf32> to vector<1x1x8x8xf32>
    tpu.vector_store %arg8[%c0_41, %c2_42, %c0_43, %c0_44], %61 {strides = array<i32>} : memref<1x4x8x8xf32, #tpu.memory_space<vmem>>, vector<1x1x8x8xf32>,
    %62 = vector.extract_strided_slice %29 {offsets = [0, 80], sizes = [8, 8], strides = [1, 1]} : vector<8x96xf32> to vector<8x8xf32>
    %c0_45 = arith.constant 0 : index
    %c2_46 = arith.constant 2 : index
    %c0_47 = arith.constant 0 : index
    %c0_48 = arith.constant 0 : index
    %63 = vector.load %arg9[%c0_45, %c2_46, %c0_47, %c0_48] : memref<1x4x8x8xf32, #tpu.memory_space<vmem>>, vector<1x1x8x8xf32>
    %64 = vector.shape_cast %63 : vector<1x1x8x8xf32> to vector<8x8xf32>
    %65 = vector.shape_cast %62 : vector<8x8xf32> to vector<1x1x8x8xf32>
    tpu.vector_store %arg9[%c0_45, %c2_46, %c0_47, %c0_48], %65 {strides = array<i32>} : memref<1x4x8x8xf32, #tpu.memory_space<vmem>>, vector<1x1x8x8xf32>,
    %66 = vector.extract_strided_slice %29 {offsets = [0, 24], sizes = [8, 8], strides = [1, 1]} : vector<8x96xf32> to vector<8x8xf32>
    %c0_49 = arith.constant 0 : index
    %c3 = arith.constant 3 : index
    %c0_50 = arith.constant 0 : index
    %c0_51 = arith.constant 0 : index
    %67 = vector.load %arg7[%c0_49, %c3, %c0_50, %c0_51] : memref<1x4x8x8xf32, #tpu.memory_space<vmem>>, vector<1x1x8x8xf32>
    %68 = vector.shape_cast %67 : vector<1x1x8x8xf32> to vector<8x8xf32>
    %69 = vector.shape_cast %66 : vector<8x8xf32> to vector<1x1x8x8xf32>
    tpu.vector_store %arg7[%c0_49, %c3, %c0_50, %c0_51], %69 {strides = array<i32>} : memref<1x4x8x8xf32, #tpu.memory_space<vmem>>, vector<1x1x8x8xf32>,
    %70 = vector.extract_strided_slice %29 {offsets = [0, 56], sizes = [8, 8], strides = [1, 1]} : vector<8x96xf32> to vector<8x8xf32>
    %c0_52 = arith.constant 0 : index
    %c3_53 = arith.constant 3 : index
    %c0_54 = arith.constant 0 : index
    %c0_55 = arith.constant 0 : index
    %71 = vector.load %arg8[%c0_52, %c3_53, %c0_54, %c0_55] : memref<1x4x8x8xf32, #tpu.memory_space<vmem>>, vector<1x1x8x8xf32>
    %72 = vector.shape_cast %71 : vector<1x1x8x8xf32> to vector<8x8xf32>
    %73 = vector.shape_cast %70 : vector<8x8xf32> to vector<1x1x8x8xf32>
    tpu.vector_store %arg8[%c0_52, %c3_53, %c0_54, %c0_55], %73 {strides = array<i32>} : memref<1x4x8x8xf32, #tpu.memory_space<vmem>>, vector<1x1x8x8xf32>,
    %74 = vector.extract_strided_slice %29 {offsets = [0, 88], sizes = [8, 8], strides = [1, 1]} : vector<8x96xf32> to vector<8x8xf32>
    %c0_56 = arith.constant 0 : index
    %c3_57 = arith.constant 3 : index
    %c0_58 = arith.constant 0 : index
    %c0_59 = arith.constant 0 : index
    %75 = vector.load %arg9[%c0_56, %c3_57, %c0_58, %c0_59] : memref<1x4x8x8xf32, #tpu.memory_space<vmem>>, vector<1x1x8x8xf32>
    %76 = vector.shape_cast %75 : vector<1x1x8x8xf32> to vector<8x8xf32>
    %77 = vector.shape_cast %74 : vector<8x8xf32> to vector<1x1x8x8xf32>
    tpu.vector_store %arg9[%c0_56, %c3_57, %c0_58, %c0_59], %77 {strides = array<i32>} : memref<1x4x8x8xf32, #tpu.memory_space<vmem>>, vector<1x1x8x8xf32>,
    return
  }
  func.func @transform_0(%arg0: i32, %arg1: i32) -> (i32, i32, i32) {
    %c0_i32 = arith.constant 0 : i32
    %c0_i32_0 = arith.constant 0 : i32
    return %arg0, %arg1, %c0_i32 : i32, i32, i32
  }
  func.func @transform_1(%arg0: i32, %arg1: i32) -> (i32, i32) {
    %c0_i32 = arith.constant 0 : i32
    %c0_i32_0 = arith.constant 0 : i32
    %c0_i32_1 = arith.constant 0 : i32
    return %c0_i32, %c0_i32_0 : i32, i32
  }
  func.func @transform_2(%arg0: i32, %arg1: i32) -> (i32, i32) {
    %c0_i32 = arith.constant 0 : i32
    %c0_i32_0 = arith.constant 0 : i32
    %c0_i32_1 = arith.constant 0 : i32
    return %c0_i32, %c0_i32_0 : i32, i32
  }
  func.func @transform_3(%arg0: i32, %arg1: i32) -> (i32, i32) {
    %c0_i32 = arith.constant 0 : i32
    %c0_i32_0 = arith.constant 0 : i32
    %c0_i32_1 = arith.constant 0 : i32
    return %c0_i32, %c0_i32_0 : i32, i32
  }
  func.func @transform_4(%arg0: i32, %arg1: i32) -> (i32, i32) {
    %c0_i32 = arith.constant 0 : i32
    %c0_i32_0 = arith.constant 0 : i32
    %c0_i32_1 = arith.constant 0 : i32
    return %c0_i32, %c0_i32_0 : i32, i32
  }
  func.func @transform_5(%arg0: i32, %arg1: i32) -> (i32, i32, i32, i32) {
    %c0_i32 = arith.constant 0 : i32
    %c0_i32_0 = arith.constant 0 : i32
    %c0_i32_1 = arith.constant 0 : i32
    return %arg0, %c0_i32, %arg1, %c0_i32_0 : i32, i32, i32, i32
  }
  func.func @transform_6(%arg0: i32, %arg1: i32) -> (i32, i32, i32, i32) {
    %c0_i32 = arith.constant 0 : i32
    %c0_i32_0 = arith.constant 0 : i32
    %c0_i32_1 = arith.constant 0 : i32
    return %arg0, %c0_i32, %arg1, %c0_i32_0 : i32, i32, i32, i32
  }
  func.func @transform_7(%arg0: i32, %arg1: i32) -> (i32, i32, i32, i32) {
    %c0_i32 = arith.constant 0 : i32
    %c0_i32_0 = arith.constant 0 : i32
    %c0_i32_1 = arith.constant 0 : i32
    return %arg0, %c0_i32, %arg1, %c0_i32_0 : i32, i32, i32, i32
  }
}

</mosaic_0001>

<bundles_post_ra>
// kernel: tpu_custom_call.1
= control target key start
LH: loop header
LB: loop body
LE: loop exit
PB: predicated region body
PF: predicated region fallthrough
CT: control target
= control target key end

     0   :  { %s1433_s0 = inlined_call_operand.hbm [shape: f32[2,8,32], index: 0, kind: input, shape index: {}]   ;;  %s1434_s1 = inlined_call_operand.vmem [shape: f32[1,32], index: 1, kind: input, shape index: {}]   ;;  %s1435_s2 = inlined_call_operand.vmem [shape: f32[1,32], index: 2, kind: input, shape index: {}]   ;;  %s1436_s3 = inlined_call_operand.hbm [shape: bf16[32,96], index: 3, kind: input, shape index: {}]   ;;  %s1437_s4 = inlined_call_operand.vmem [shape: f32[1,96], index: 4, kind: input, shape index: {}]   ;;  %s1438_s5 = inlined_call_operand.hbm [shape: f32[2,4,8,8], index: 5, kind: output, shape index: {0}]   ;;  %s1439_s6 = inlined_call_operand.hbm [shape: f32[2,4,8,8], index: 6, kind: output, shape index: {1}]   ;;  %s1440_s7 = inlined_call_operand.hbm [shape: f32[2,4,8,8], index: 7, kind: output, shape index: {2}]  }
   0x1   :  { %1446 = sst [smem:[#allocation18_spill]] %s1436_s3 }
   0x2   :  { %13 = vsyncpa [#allocation3], 0 }
   0x3   :  { %15 = vsyncpa [#allocation3 + $0x1], 0 }
   0x4   :  { %16 = vsyncpa [#allocation6], 0 }
   0x5   :  { %17 = vsyncpa [#allocation4], 0 }
   0x6   :  { %19 = vsyncpa [#allocation4 + $0x1], 0 }
   0x7   :  { %20 = vsyncpa [#allocation9], 0 }
   0x8   :  { %22 = vsyncpa [#allocation9 + $0x1], 0  ;;  %s1137_s24 = smov 0   ;;  %s1139_s25 = smov 0  }
   0x9   :  { %s1141_s26 = smov 0   ;;  %s1143_s27 = smov 0  }
   0xa   :  { %s1145_s28 = smov 0   ;;  %s1147_s29 = smov 0  }
   0xb LB: > { %1447 = sst [smem:[#allocation15_spill]] %s1069_s28  ;;  %s1168_s30 = sadd.s32 4294967295, %s1073_s29   ;;  %s1073_s29 = sphi %s1147_s29, %s28_s29   ;;  %s1069_s28 = sphi %s1145_s28, %s1466_s28   ;;  %s1065_s27 = sphi %s1143_s27, %s1465_s27   ;;  %s1061_s26 = sphi %s1141_s26, %s1469_s26   ;;  %s1057_s25 = sphi %s1139_s25, %s1468_s25   ;;  %s1053_s24 = sphi %s1137_s24, %s1467_s24  }
   0xc   : > { %s1441_s8 = sadd.s32 4294967294, %s1073_s29   ;;  %p62_p0 = scmp.ne.s32.totalorder %s1057_s25, %s1053_s24 }
   0xd   : > { %p1445_p1 = scmp.eq.s32.totalorder %s1168_s30, 0  ;;  %p178_p3 = scmp.eq.s32.totalorder %s1441_s8, 1 }
   0xe   : > { %p724_p5 = scmp.ge.s32.totalorder %s1073_s29, 1  ;;  %p241_p7 = scmp.lt.s32.totalorder %s1073_s29, 3 }
   0xf   : > { %p1179_p4 = por %p1445_p1, %p62_p0  ;;  %p1184_p6 = por %p178_p3, %p62_p0 }
  0x10   : > { %p1189_p8 = pnand %p724_p5, %p241_p7  ;;  %s1075_s12 = smov [#allocation5]  }
  0x11   : > { %s1449_s10 = scalar_select %p1184_p6, 1, 0 }
  0x12   : > { %s259_s13 = sshll.u32 %s1075_s12, 4  ;;  %p787_p9 = pneg %p1189_p8  ;;  %s260_s13 = int_to_ptr.vmem [resolvable:$true] %s259_s13 }
  0x13   : > { %1450 = sst [smem:[#allocation16_spill]] %s1449_s10  ;;  %s40_s15 = sadd.s32 1, %s1069_s28 }
  0x14   : > { %p1198_p11 = pnand %p787_p9, %p1445_p1  ;;  %s890_s16 = scalar_lea.vmem %s260_s13, 256 }
  0x15   : > { %p891_p13 = scmp.ne.s32.totalorder %s260_s13, %s890_s16  ;;  %p898_p5 = scmp.lt.s32.totalorder %s260_s13, %s260_s13 }
  0x16   : > { %p881_p12 = pneg %p1198_p11  ;;  %p899_p7 = scmp.lt.s32.totalorder %s890_s16, %s890_s16 }
  0x18   : > { %p893_p0 = pnand %p891_p13, %p881_p12  ;;  %p900_p2 = por %p899_p7, %p898_p5 }
  0x1a   : > { %p894_p3 = pneg %p893_p0 }
  0x1c   : > { %p901_p6 = pnand %p900_p2, %p894_p3 }
  0x1e   : > { %904 = shalt.err (!%p901_p6)
}
  0x1f   : > { %s1076_s17 = smov 64   ;;  %s1077_s18 = smov 4  }
  0x20   : > { %s1453_s3 = sld [smem:[#allocation18_spill]]  ;;  %p42_p2 = scmp.ge.s32.totalorder %s40_s15, 2 }
  0x21   : > { %s49_s21 = sadd.s32 1, %s1061_s26  ;;  %p56_p6 = scmp.ne.s32.totalorder %s1061_s26, %s1057_s25 }
  0x22   : > { %p57_p9 = scmp.eq.s32.totalorder %s1073_s29, 0  ;;  %s1471_s15 = smov (%p42_p2, %s40_s15), 0 }
  0x23   : > { %1454 = sst [smem:[#allocation17_spill]] %s1471_s15  ;;  %p1456_p13 = scmp.eq.s32.totalorder %s1168_s30, 1 }
  0x24   : > { %p1216_p12 = por %p57_p9, %p56_p6  ;;  %s44_s12 = ssub.s32 %s1069_s28, %s1471_s15 }
  0x25   : > { %p1222_p0 = por %p1456_p13, %p56_p6  ;;  %p806_p3 = scmp.lt.s32.totalorder %s1073_s29, 2 }
  0x26   : > { %790 = dma.hbm_to_vmem [thread:$0]  (!%p1198_p11), %s1453_s3, 256, %s260_s13, [#allocation6], %s1076_s17, %s1076_s17, %s1077_s18  }
  0x27   : > { %p47_p11 = scmp.eq.s32.totalorder %s44_s12, 0  ;;  %s276_s13 = sand.u32 1, %s1061_s26  }
  0x28   : > { %s727_s14 = sshll.u32 %s276_s13, 3  ;;  %s728_s17 = sshll.u32 %s1069_s28, 7 }
  0x29   : > { %s1231_s16 = scalar_select %p47_p11, %s1061_s26, %s49_s21  }
  0x2a   : > { %s286_s20 = scalar_lea.hbm %s1433_s0, %s728_s17  ;;  %s280_s8 = scalar_lea.vmem [#allocation2], %s727_s14 }
  0x2b   : > { %s288_s3 = sshll.u32 %s280_s8, 4  ;;  %p1239_p5 = pnand %p806_p3, %p1216_p12  ;;  %s289_s3 = int_to_ptr.vmem [resolvable:$true] %s288_s3 }
  0x2c   : > { %s277_s15 = scalar_lea.sflag [#allocation3], %s276_s13  ;;  %s918_s12 = scalar_lea.vmem %s289_s3, 128 }
  0x2d   : > { %p907_p7 = pneg %p1239_p5  ;;  %p919_p2 = scmp.ne.s32.totalorder %s289_s3, %s918_s12 }
  0x2e   : > { %s1078_s21 = smov [#allocation2]  }
  0x2f   : > { %p921_p6 = pnand %p919_p2, %p907_p7  ;;  %s923_s28 = sshll.u32 %s1078_s21, 4  ;;  %s924_s28 = int_to_ptr.vmem [resolvable:$false] %s923_s28 }
  0x30   : > { %s925_s17 = scalar_lea.vmem %s924_s28, 256  ;;  %p926_p13 = scmp.lt.s32.totalorder %s289_s3, %s924_s28 }
  0x31   : > { %p922_p9 = pneg %p921_p6  ;;  %p927_p11 = scmp.lt.s32.totalorder %s925_s17, %s918_s12 }
  0x33   : > { %p928_p10 = por %p927_p11, %p926_p13 }
  0x35   : > { %p929_p1 = pnand %p928_p10, %p922_p9 }
  0x37   : > { %932 = shalt.err (!%p929_p1)
}
  0x38   : > { %794 = dma.hbm_to_vmem [thread:$0]  (!%p1239_p5), %s286_s20, 128, %s289_s3, %s277_s15  }
  0x39   : > { %297 = sbr.rel (%p1189_p8) target bundleno = 755 (0x2f3), region = 40  ;;  %s1250_s8 = sand.u32 (!%p1189_p8), 1, %s1057_s25  }
  0x3a   : > { %s730_s22 = sshll.u32 (!%p1189_p8), %s1250_s8, 3  ;;  %s300_s13 = scalar_lea.sflag (!%p1189_p8), [#allocation3], %s1250_s8 }
  0x3b   : > { %s303_s14 = scalar_lea.vmem (!%p1189_p8), [#allocation2], %s730_s22 }
  0x3e   : > { %1036 = dma.done.wait (%p1179_p4), %s300_s13, 128  }
  0x3f   : > { %1038 = vsyncadd (%p1179_p4), %s300_s13, 4294967168  ;;  %p1459_p1 = scmp.eq.s32.totalorder %s1168_s30, 0 }
  0x41   : > { %1040 = dma.done.wait (%p1459_p1), [#allocation6], 256   ;;  %p1460_p10 = pmov %p1459_p1 }
  0x42   : > { %vm352_vm0 = vcmask 261120   ;;  %v349_v0 = vld [vmem:[%s303_s14] sm:$0xff]  ;;  %v875_v7 = vld [vmem:[#allocation5 + $0x8] sm:$0xff]   ;;  %v1079_v8 = vmov 0.0   ;;  %vm1080_vm1 = vmmov 0   ;;  %v876_v9 = vld [vmem:[#allocation5] sm:$0xff]  }
  0x43   : > { %1042 = vsyncadd (%p1460_p10), [#allocation6], 4294967040  ;;  %v353_v1 = vsel %vm352_vm0, %v349_v0, 0.0  ;;  %767 = vmatprep.subr.bf16.mxu0 %v1079_v8  ;;  %771 = vmatprep.mubr.msk.bf16.mxu0 %vm1080_vm1, %v1079_v8  ;;  %v735_v14 = vld [vmem:[%s1434_s1] ss:$0 sm:$0xff]  ;;  %s1272_s11 = sshll.u32 %s1250_s8, 5 }
  0x44   : > { %354 = vadd.xlane.f32.xlu0 %v353_v1  ;;  %768 = vmatpush3.bf16.msra.mxu0 %v875_v7  ;;  %v736_v16 = vld [vmem:[%s1435_s2] ss:$0 sm:$0xff]  ;;  %vm448_vm2 = vcmask 64512   ;;  %s1081_s19 = smov 80   ;;  %s1082_s20 = smov 96  }
  0x45   : > { %769 = vmatprep.subr.bf16.mxu0 %v1079_v8  ;;  %v737_v20 = vld [vmem:[%s1437_s4] ss:$0 sm:$0xff]  ;;  %s1278_s12 = scalar_lea.vmem [#allocation7], %s1272_s11  ;;  %s1083_s21 = smov 104  }
  0x46   : > { %s1084_s17 = smov 88   ;;  %s1085_s22 = smov 72  }
  0x47   : > { %s1086_s13 = smov 64   ;;  %s1087_s14 = smov 120  }
  0x48   : > { %770 = vmatpush3.bf16.msra.mxu0 %v876_v9  ;;  %s1088_s3 = smov 56   ;;  %s1089_s28 = smov 112  }
  0x49   : > { %s1090_s9 = smov 48   ;;  %s1091_s10 = smov 40  }
  0x4a   : > { %s340_s15 = scalar_lea.vmem [#allocation8], %s1272_s11 }
  0x4b   : > { %s546_s18 = sshll.u32 %s340_s15, 4  ;;  %s1289_s18 = int_to_ptr.vmem [resolvable:$true] %s546_s18 }
  0xcd   : > { %v355_v2 = vpop.xlane.xlu0 %354 }
  0xce   : > { %v357_v3 = vmul.f32 0.03125, %v355_v2 }
  0xd0   : > { %v358_v4 = vsub.f32 %v349_v0, %v357_v3 }
  0xd2   : > { %v359_v5 = vmul.f32 %v358_v4, %v358_v4 }
  0xd4   : > { %v360_v6 = vsel %vm352_vm0, %v359_v5, 0.0 }
  0xd5   : > { %361 = vadd.xlane.f32.xlu0 %v360_v6 }
 0x15e   : > { %v362_v10 = vpop.xlane.xlu0 %361 }
 0x15f   : > { %v363_v11 = vmul.f32 0.03125, %v362_v10 }
 0x161   : > { %v364_v12 = vadd.f32 1e-05, %v363_v11 }
 0x163   : > { %877 = vrsqrt.f32 %v364_v12 }
 0x170   : > { %v878_v13 = vpop.eup %877 }
 0x171   : > { %v366_v15 = vmul.f32 %v878_v13, %v358_v4 }
 0x173   : > { %v373_v17 = vmul.f32 %v735_v14, %v366_v15 }
 0x175   : > { %v380_v18 = vadd.f32 %v736_v16, %v373_v17 }
 0x177   : > { %v381_v19 = vpack.c.bf16 %v380_v18, %v380_v18 }
 0x179   : > { %772 = vmatmul.mubr.msk.bf16.vlgmr.msra.gmra.mxu0 %vm352_vm0, %v381_v19 }
 0x239   : > { %v442_v21 = vpop.f32.mrf.mxu0 }
 0x23a   : > { %v443_v22 = vadd.f32 %v737_v20, %v442_v21 }
 0x23b   : > { %v773_v23 = vpop.f32.mrf.mxu0 }
 0x23c   : > { %479 = vrot.lane.b32.xlu0 %v443_v22, %s1081_s19  ;;  %451 = vrot.lane.b32.xlu1 %v443_v22, %s1082_s20  ;;  %449 = vst.msk [vmem:[%s1278_s12] sm:$0xff] %vm448_vm2, %v443_v22  ;;  %s509_s19 = sand.u32 1, %s1168_s30   ;;  %s1287_s20 = sshll.u32 %s1065_s27, 9 }
 0x23d   : > { %v445_v24 = vpop.f32.mrf.mxu0  ;;  %s1301_s27 = scalar_lea.sflag [#allocation9], %s509_s19  ;;  %s933_s30 = scalar_lea.vmem %s1289_s18, 512 }
 0x23e   : > { %p934_p4 = scmp.ne.s32.totalorder %s1289_s18, %s933_s30 }
 0x23f   : > { %v774_v25 = vpop.f32.mrf.mxu0 }
 0x240   : > { %489 = vrot.lane.b32.xlu0 %v443_v22, %s1083_s21  ;;  %464 = vrot.lane.b32.xlu1 %v443_v22, %s1084_s17  ;;  %p935_p8 = pnand %p934_p4, %p1222_p0 }
 0x242   : > { %p936_p12 = pneg %p935_p8 }
 0x244   : > { %494 = vrot.lane.b32.xlu1 %v443_v22, %s1085_s22  ;;  %s1298_s22 = scalar_lea.hbm %s1439_s6, %s1287_s20 }
 0x248   : > { %455 = vrot.lane.b32.xlu1 %v443_v22, %s1086_s13  ;;  %s1092_s13 = smov [#allocation8]  }
 0x24c   : > { %459 = vrot.lane.b32.xlu1 %v443_v22, %s1087_s14  ;;  %s937_s14 = sshll.u32 %s1092_s13, 4  ;;  %s938_s14 = int_to_ptr.vmem [resolvable:$false] %s937_s14 }
 0x24d   : > { %p940_p3 = scmp.lt.s32.totalorder %s1289_s18, %s938_s14 }
 0x250   : > { %469 = vrot.lane.b32.xlu1 %v443_v22, %s1088_s3  ;;  %s939_s3 = scalar_lea.vmem %s938_s14, 1024 }
 0x251   : > { %p941_p5 = scmp.lt.s32.totalorder %s939_s3, %s933_s30 }
 0x253   : > { %p942_p7 = por %p941_p5, %p940_p3 }
 0x254   : > { %474 = vrot.lane.b32.xlu1 %v443_v22, %s1089_s28 }
 0x255   : > { %p943_p2 = pnand %p942_p7, %p936_p12 }
 0x258   : > { %484 = vrot.lane.b32.xlu1 %v443_v22, %s1090_s9 }
 0x25c   : > { %499 = vrot.lane.b32.xlu1 %v443_v22, %s1091_s10 }
 0x2ae   : > { %v480_v26 = vpop.permute.xlu0 %479  ;;  %v452_v27 = vpop.permute.xlu1 %451 }
 0x2af   : > { %745 = vst.msk [vmem:[%s340_s15 + $0x10] sm:$0xff] %vm448_vm2, %v480_v26  ;;  %454 = vst.msk [vmem:[%s340_s15] sm:$0xff] %vm448_vm2, %v452_v27 }
 0x2b2   : > { %v490_v28 = vpop.permute.xlu0 %489  ;;  %v465_v29 = vpop.permute.xlu1 %464 }
 0x2b3   : > { %747 = vst.msk [vmem:[%s1278_s12 + $0x18] sm:$0xff] %vm448_vm2, %v490_v28  ;;  %742 = vst.msk [vmem:[%s340_s15 + $0x8] sm:$0xff] %vm448_vm2, %v465_v29 }
 0x2b6   : > { %v495_v30 = vpop.permute.xlu1 %494 }
 0x2b7   : > { %748 = vst.msk [vmem:[%s340_s15 + $0x18] sm:$0xff] %vm448_vm2, %v495_v30 }
 0x2b8   : > { %946 = shalt.err (!%p943_p2)
}
 0x2b9   : > { %s947_s28 = scalar_lea.hbm %s1298_s22, 512  ;;  %s951_s15 = scalar_lea.hbm %s1439_s6, 1024 }
 0x2ba   : > { %p948_p6 = scmp.ne.s32.totalorder %s1298_s22, %s947_s28  ;;  %p952_p11 = scmp.lt.s32.totalorder %s1298_s22, %s1439_s6 }
 0x2bb   : > { %p953_p1 = scmp.lt.s32.totalorder %s951_s15, %s947_s28 }
 0x2bc   : > { %p949_p9 = pnand %p948_p6, %p1222_p0 }
 0x2bd   : > { %p954_p10 = por %p953_p1, %p952_p11 }
 0x2be   : > { %p950_p13 = pneg %p949_p9 }
 0x2c0   : > { %p955_p4 = pnand %p954_p10, %p950_p13 }
 0x2c2   : > { %958 = shalt.err (!%p955_p4)
}
 0x2c3   : > { %s1093_s17 = smov 128   ;;  %s1094_s30 = smov 8   ;;  %v456_v31 = vpop.permute.xlu1 %455 }
 0x2c4   : > { %782 = dma.vmem_to_hbm [thread:$0]  (%p1222_p0), %s1289_s18, 512, %s1298_s22, %s1301_s27, %s1093_s17, %s1093_s17, %s1094_s30  }
 0x2c5   : > { %s1328_s13 = scalar_lea.vmem [#allocation10], %s1272_s11  ;;  %s529_s14 = sshll.u32 %s1278_s12, 4  ;;  %s1337_s14 = int_to_ptr.vmem [resolvable:$true] %s529_s14 }
 0x2c6   : > { %458 = vst.msk [vmem:[%s1328_s13] sm:$0xff] %vm448_vm2, %v456_v31  ;;  %s1343_s11 = scalar_lea.hbm %s1438_s5, %s1287_s20  ;;  %s505_s18 = scalar_lea.sflag [#allocation4], %s1250_s8 }
 0x2c7   : > { %v460_v32 = vpop.permute.xlu1 %459  ;;  %s959_s22 = scalar_lea.vmem %s1337_s14, 512  ;;  %s1095_s9 = smov [#allocation7]  }
 0x2c8   : > { %741 = vst.msk [vmem:[%s1278_s12 + $0x8] sm:$0xff] %vm448_vm2, %v460_v32  ;;  %p960_p8 = scmp.ne.s32.totalorder %s1337_s14, %s959_s22  ;;  %s963_s10 = sshll.u32 %s1095_s9, 4  ;;  %s964_s10 = int_to_ptr.vmem [resolvable:$false] %s963_s10 }
 0x2c9   : > { %s965_s15 = scalar_lea.vmem %s964_s10, 1024  ;;  %p966_p5 = scmp.lt.s32.totalorder %s1337_s14, %s964_s10 }
 0x2ca   : > { %p961_p12 = pnand %p960_p8, %p1222_p0  ;;  %p967_p7 = scmp.lt.s32.totalorder %s965_s15, %s959_s22 }
 0x2cb   : > { %v470_v33 = vpop.permute.xlu1 %469 }
 0x2cc   : > { %743 = vst.msk [vmem:[%s1328_s13 + $0x8] sm:$0xff] %vm448_vm2, %v470_v33  ;;  %p962_p3 = pneg %p961_p12  ;;  %p968_p2 = por %p967_p7, %p966_p5 }
 0x2ce   : > { %p969_p6 = pnand %p968_p2, %p962_p3 }
 0x2cf   : > { %v475_v34 = vpop.permute.xlu1 %474 }
 0x2d0   : > { %744 = vst.msk [vmem:[%s1278_s12 + $0x10] sm:$0xff] %vm448_vm2, %v475_v34 }
 0x2d1   : > { %972 = shalt.err (!%p969_p6)
}
 0x2d2   : > { %s973_s12 = scalar_lea.hbm %s1343_s11, 512  ;;  %s977_s21 = scalar_lea.hbm %s1438_s5, 1024 }
 0x2d3   : > { %p974_p9 = scmp.ne.s32.totalorder %s1343_s11, %s973_s12  ;;  %p978_p1 = scmp.lt.s32.totalorder %s1343_s11, %s1438_s5 }
 0x2d4   : > { %p979_p10 = scmp.lt.s32.totalorder %s977_s21, %s973_s12 }
 0x2d5   : > { %p975_p13 = pnand %p974_p9, %p1222_p0 }
 0x2d6   : > { %p980_p4 = por %p979_p10, %p978_p1 }
 0x2d7   : > { %p976_p11 = pneg %p975_p13 }
 0x2d9   : > { %p981_p8 = pnand %p980_p4, %p976_p11 }
 0x2db   : > { %984 = shalt.err (!%p981_p8)
}
 0x2dc   : > { %781 = dma.vmem_to_hbm [thread:$0]  (%p1222_p0), %s1337_s14, 512, %s1343_s11, %s505_s18, %s1093_s17, %s1093_s17, %s1094_s30   ;;  %v485_v35 = vpop.permute.xlu1 %484 }
 0x2dd   : > { %s563_s22 = sshll.u32 %s1328_s13, 4  ;;  %746 = vst.msk [vmem:[%s1328_s13 + $0x10] sm:$0xff] %vm448_vm2, %v485_v35  ;;  %s1380_s15 = scalar_lea.hbm %s1440_s7, %s1287_s20  ;;  %s1374_s22 = int_to_ptr.vmem [resolvable:$true] %s563_s22 }
 0x2de   : > { %s985_s12 = scalar_lea.vmem %s1374_s22, 512  ;;  %s1096_s14 = smov [#allocation10]  }
 0x2df   : > { %p986_p12 = scmp.ne.s32.totalorder %s1374_s22, %s985_s12  ;;  %s989_s11 = sshll.u32 %s1096_s14, 4  ;;  %s990_s11 = int_to_ptr.vmem [resolvable:$false] %s989_s11 }
 0x2e0   : > { %v500_v36 = vpop.permute.xlu1 %499  ;;  %s991_s18 = scalar_lea.vmem %s990_s11, 1024  ;;  %p992_p7 = scmp.lt.s32.totalorder %s1374_s22, %s990_s11 }
 0x2e1   : > { %749 = vst.msk [vmem:[%s1328_s13 + $0x18] sm:$0xff] %vm448_vm2, %v500_v36  ;;  %p987_p3 = pnand %p986_p12, %p1222_p0  ;;  %p993_p2 = scmp.lt.s32.totalorder %s991_s18, %s985_s12 }
 0x2e3   : > { %p988_p5 = pneg %p987_p3  ;;  %p994_p6 = por %p993_p2, %p992_p7 }
 0x2e5   : > { %p995_p9 = pnand %p994_p6, %p988_p5 }
 0x2e7   : > { %998 = shalt.err (!%p995_p9)
}
 0x2e8   : > { %s999_s20 = scalar_lea.hbm %s1380_s15, 512  ;;  %s1003_s19 = scalar_lea.hbm %s1440_s7, 1024 }
 0x2e9   : > { %p1000_p13 = scmp.ne.s32.totalorder %s1380_s15, %s999_s20  ;;  %p1004_p10 = scmp.lt.s32.totalorder %s1380_s15, %s1440_s7 }
 0x2ea   : > { %p1005_p4 = scmp.lt.s32.totalorder %s1003_s19, %s999_s20 }
 0x2eb   : > { %p1001_p11 = pnand %p1000_p13, %p1222_p0 }
 0x2ec   : > { %p1006_p8 = por %p1005_p4, %p1004_p10 }
 0x2ed   : > { %p1002_p1 = pneg %p1001_p11 }
 0x2ef   : > { %p1007_p12 = pnand %p1006_p8, %p1002_p1 }
 0x2f1   : > { %1010 = shalt.err (!%p1007_p12)
}
 0x2f2   : > { %783 = dma.vmem_to_hbm [thread:$0]  (%p1222_p0), %s1374_s22, 512, %s1380_s15, %s1301_s27, %s1093_s17, %s1093_s17, %s1094_s30  }
 0x2f3 PF: > { %s1461_s28 = sld [smem:[#allocation16_spill]]  ;;  %s578_s9 = sand.u32 1, %s1053_s24  }
 0x2f4   : > { %p1463_p5 = scmp.ge.s32.totalorder %s1073_s29, 2  ;;  %s579_s10 = scalar_lea.sflag [#allocation4], %s578_s9 }
 0x2f9   : > { %p1462_p3 = scmp.ne.s32.totalorder %s1461_s28, 0 }
 0x2fb   : > { %p796_p7 = pnand %p1463_p5, %p1462_p3 }
 0x2fd   : > { %p797_p2 = pneg %p796_p7 }
 0x2ff   : > { %1044 = dma.done.wait (%p797_p2), %s579_s10, 512  }
 0x300   : > { %1046 = vsyncadd (%p797_p2), %s579_s10, 4294966784  ;;  %s1464_s23 = sadd.s32 4294967294, %s1073_s29  }
 0x301   : > { %s587_s12 = sand.u32 1, %s1464_s23  }
 0x302   : > { %s588_s14 = scalar_lea.sflag [#allocation9], %s587_s12 }
 0x303   : > { %1048 = dma.done.wait (%p797_p2), %s588_s14, 1024  }
 0x304   : > { %1050 = vsyncadd (%p797_p2), %s588_s14, 4294966272  ;;  %s28_s29 = sadd.s32 1, %s1073_s29   ;;  %s1465_s27 = sld [smem:[#allocation15_spill]] }
 0x305   : > { %p25_p0 = scmp.ge.s32.totalorder %s28_s29, 4   ;;  %s1466_s28 = sld [smem:[#allocation17_spill]] }
 0x306   : > { %s1467_s24 = smov %s1057_s25  ;;  %s1468_s25 = smov %s1061_s26 }
 0x307   : > { %s1469_s26 = smov %s1231_s16  ;;  %27 = sbr.rel (!%p25_p0) target bundleno = 11 (0xb), region = 130 }
 0x30c   :  { %602 = vsyncpa [#allocation3], 1 }
 0x30d   :  { %604 = vsyncpa [#allocation3 + $0x1], 1 }
 0x30e   :  { %605 = vsyncpa [#allocation6], 1 }
 0x30f   :  { %606 = vsyncpa [#allocation4], 1 }
 0x310   :  { %608 = vsyncpa [#allocation4 + $0x1], 1 }
 0x311   :  { %609 = vsyncpa [#allocation9], 1 }
 0x312   :  { %611 = vsyncpa [#allocation9 + $0x1], 1 }

</bundles_post_ra>
